<compile_context>
chip_gen: v6e
topology: v6e:2x2x1
jax: 0.10.0
libtpu: 0.0.40
codegen_flags: <defaults>
</compile_context>

<pallas_src>
import functools

import jax
import jax.numpy as jnp
from jax.experimental import pallas as pl
from jax.experimental.pallas import tpu as pltpu


def _round_up(x: int, m: int) -> int:
    return ((x + m - 1) // m) * m


def _choose_tile(dim: int, align: int, preferred: int) -> int:
    """Largest align-multiple tile <= preferred that divides the padded dim."""
    dim_a = _round_up(dim, align)
    if dim_a <= preferred:
        return dim_a                      # whole dim in one tile
    t = (preferred // align) * align
    while t > align and dim_a % t:
        t -= align
    return t                              # divides dim_a -> no extra padding


def _linear_kernel(x_ref, w_ref, b_ref, o_ref):
    j = pl.program_id(1)
    k = pl.program_id(2)
    tn = o_ref.shape[1]

    @pl.when(k == 0)
    def _():
        # Seed the K-resident output tile with the bias row (broadcast over
        # rows).  Output dtype is f32, so we accumulate straight into o_ref:
        # no separate VMEM scratch, no finalize copy sweep.
        col0 = pl.multiple_of(j * tn, 128)
        o_ref[...] = jnp.broadcast_to(b_ref[:, pl.ds(col0, tn)], o_ref.shape)

    # MXU matmul with f32 accumulation directly into the resident output tile.
    o_ref[...] += jnp.dot(
        x_ref[...], w_ref[...], preferred_element_type=jnp.float32
    )


@functools.partial(jax.jit, static_argnames=("tm", "tn", "tk"))
def my_linear(x, weight, bias, *, tm: int = 512, tn: int = 512, tk: int = 1024):
    """Computes x @ weight + bias with a tiled Pallas TPU kernel.

    x:      (M, K) float32
    weight: (K, N) float32
    bias:   (N,)   float32
    returns (M, N) float32
    """
    M, K = x.shape
    K2, N = weight.shape
    assert K == K2, "inner dims must match"
    assert bias.shape == (N,), "bias must be (out_num,)"

    # Tile choice: (8, 128)-aligned, as large as possible, and dividing the
    # minimally padded dims so aligned shapes avoid any jnp.pad copy.
    tm = _choose_tile(M, 8, tm)
    tk = _choose_tile(K, 128, tk)
    tn = _choose_tile(N, 128, tn)

    Mp, Kp, Np = _round_up(M, tm), _round_up(K, tk), _round_up(N, tn)

    # v7x has 2 TensorCores: if the whole problem collapsed into a single
    # (tm, tn) tile, split one parallel axis so the grid can shard across
    # cores.  Harmless on single-TC v5e/v6e.
    if Mp // tm == 1 and Np // tn == 1:
        if Mp >= 16 and (Mp // 2) % 8 == 0:
            tm = Mp // 2
        elif Np >= 256 and (Np // 2) % 128 == 0:
            tn = Np // 2

    # Zero-pad only where required (K-padding contributes zeros to the dot;
    # M/N padding keeps blocks (8,128)-aligned and the output lane-dense).
    x_p = x if (Mp, Kp) == (M, K) else jnp.pad(x, ((0, Mp - M), (0, Kp - K)))
    w_p = weight if (Kp, Np) == (K, N) else jnp.pad(
        weight, ((0, Kp - K), (0, Np - N)))
    b_p = bias.reshape(1, N)
    if Np != N:
        b_p = jnp.pad(b_p, ((0, 0), (0, Np - N)))

    grid = (Mp // tm, Np // tn, Kp // tk)

    # VMEM budget from the real tile footprint: double-buffered X/W/out tiles
    # plus the resident bias row, with headroom.  Capped at v7x's 64 MiB.
    itemsize = jnp.dtype(x.dtype).itemsize
    tile_bytes = itemsize * (2 * tm * tk + 2 * tk * tn + 2 * tm * tn + Np)
    vmem_limit = int(min(max(tile_bytes + (4 << 20), 16 << 20), 64 << 20))

    cost = pl.CostEstimate(
        flops=2 * Mp * Np * Kp,
        transcendentals=0,
        bytes_accessed=itemsize * (Mp * Kp + Kp * Np + Mp * Np + Np),
    )

    out_p = pl.pallas_call(
        _linear_kernel,
        out_shape=jax.ShapeDtypeStruct((Mp, Np), x.dtype),
        grid_spec=pltpu.PrefetchScalarGridSpec(
            num_scalar_prefetch=0,
            grid=grid,
            in_specs=[
                pl.BlockSpec((tm, tk), lambda i, j, k: (i, k)),  # X tile
                pl.BlockSpec((tk, tn), lambda i, j, k: (k, j)),  # W tile
                pl.BlockSpec((1, Np), lambda i, j, k: (0, 0)),   # resident bias
            ],
            out_specs=pl.BlockSpec((tm, tn), lambda i, j, k: (i, j)),
        ),
        compiler_params=pltpu.CompilerParams(
            dimension_semantics=("parallel", "parallel", "arbitrary"),
            vmem_limit_bytes=vmem_limit,
        ),
        cost_estimate=cost,
    )(x_p, w_p, b_p)

    if (Mp, Np) != (M, N):
        out_p = out_p[:M, :N]
    return out_p


def _reference(x, w, b):
    return jnp.dot(x, w, precision=jax.lax.Precision.HIGHEST) + b


if __name__ == "__main__":
    # Deterministic parameters + input (mirrors nn.Parameter(torch.randn(...))).
    in_num, out_num = 32, 16
    batch = 8

    key = jax.random.PRNGKey(0)
    k_w, k_b, k_x = jax.random.split(key, 3)
    weight = jax.random.normal(k_w, (in_num, out_num), dtype=jnp.float32)
    bias = jax.random.normal(k_b, (out_num,), dtype=jnp.float32)
    x = jax.random.normal(k_x, (batch, in_num), dtype=jnp.float32)

    out = jax.block_until_ready(my_linear(x, weight, bias))
    ref = _reference(x, weight, bias)
    assert out.shape == (batch, out_num)
    assert jnp.allclose(out, ref, atol=1e-4, rtol=1e-4), "mismatch vs reference"

    # Secondary check: no-padding path, single K step, parallel split for v7x.
    k_w2, k_b2, k_x2 = jax.random.split(jax.random.PRNGKey(1), 3)
    M2, K2_, N2 = 512, 640, 256
    w2 = jax.random.normal(k_w2, (K2_, N2), dtype=jnp.float32)
    b2 = jax.random.normal(k_b2, (N2,), dtype=jnp.float32)
    x2 = jax.random.normal(k_x2, (M2, K2_), dtype=jnp.float32)
    out2 = jax.block_until_ready(my_linear(x2, w2, b2))
    assert jnp.allclose(out2, _reference(x2, w2, b2), atol=1e-3, rtol=1e-4), \
        "mismatch (single-K-step path)"

    # Tertiary check: true multi-tile path (grid (2, 2, 3), K-accumulation).
    k_w3, k_b3, k_x3 = jax.random.split(jax.random.PRNGKey(2), 3)
    M3, K3, N3 = 1024, 2304, 1024
    w3 = jax.random.normal(k_w3, (K3, N3), dtype=jnp.float32)
    b3 = jax.random.normal(k_b3, (N3,), dtype=jnp.float32)
    x3 = jax.random.normal(k_x3, (M3, K3), dtype=jnp.float32)
    out3 = jax.block_until_ready(my_linear(x3, w3, b3))
    assert jnp.allclose(out3, _reference(x3, w3, b3), atol=1e-3, rtol=1e-4), \
        "mismatch (multi-tile path)"

    print("KERNEL_OK")
</pallas_src>

<mosaic_0001>
module attributes {stable_mosaic.version = 11 : i64} {
  func.func @_linear_kernel(%arg0: i32, %arg1: i32, %arg2: i32, %arg3: memref<8x128xf32, #tpu.memory_space<vmem>>, %arg4: memref<128x128xf32, #tpu.memory_space<vmem>>, %arg5: memref<1x128xf32, #tpu.memory_space<vmem>>, %arg6: memref<8x128xf32, #tpu.memory_space<vmem>>) attributes {dimension_semantics = [#tpu.dimension_semantics<parallel>, #tpu.dimension_semantics<parallel>, #tpu.dimension_semantics<arbitrary>], iteration_bounds = array<i64: 1, 1, 1>, scalar_prefetch = 0 : i64, scratch_operands = 0 : i64, tpu.core_type = #tpu.core_type<tc>, window_params = [{transform_indices = @transform_0, window_bounds = array<i64: 8, 128>}, {transform_indices = @transform_1, window_bounds = array<i64: 128, 128>}, {pipeline_mode = #tpu.pipeline_mode<synchronous>, transform_indices = @transform_2, window_bounds = array<i64: 1, 128>}, {transform_indices = @transform_3, window_bounds = array<i64: 8, 128>}]} {
    %c0_i32 = arith.constant 0 : i32
    %0 = arith.cmpi eq, %arg2, %c0_i32 : i32
    %1 = arith.extui %0 : i1 to i32
    %c0_i32_0 = arith.constant 0 : i32
    %2 = arith.cmpi ne, %1, %c0_i32_0 : i32
    scf.if %2 {
      %c128_i32 = arith.constant 128 : i32
      %9 = arith.muli %arg1, %c128_i32 : i32
      %10 = tpu.assume_multiple %9, 128 : i32
      %c0_8 = arith.constant 0 : index
      %11 = arith.index_cast %10 : i32 to index
      %12 = vector.load %arg5[%c0_8, %11] : memref<1x128xf32, #tpu.memory_space<vmem>>, vector<1x128xf32>
      %13 = vector.shape_cast %12 : vector<1x128xf32> to vector<1x128xf32>
      %14 = vector.broadcast %13 : vector<1x128xf32> to vector<8x128xf32>
      %c0_9 = arith.constant 0 : index
      %c0_10 = arith.constant 0 : index
      %15 = vector.load %arg6[%c0_9, %c0_10] : memref<8x128xf32, #tpu.memory_space<vmem>>, vector<8x128xf32>
      tpu.vector_store %arg6[%c0_9, %c0_10], %14 {strides = array<i32>} : memref<8x128xf32, #tpu.memory_space<vmem>>, vector<8x128xf32>,
    } else {
    }
    %c0 = arith.constant 0 : index
    %c0_1 = arith.constant 0 : index
    %3 = vector.load %arg6[%c0, %c0_1] : memref<8x128xf32, #tpu.memory_space<vmem>>, vector<8x128xf32>
    %c0_2 = arith.constant 0 : index
    %c0_3 = arith.constant 0 : index
    %4 = vector.load %arg3[%c0_2, %c0_3] : memref<8x128xf32, #tpu.memory_space<vmem>>, vector<8x128xf32>
    %c0_4 = arith.constant 0 : index
    %c0_5 = arith.constant 0 : index
    %5 = vector.load %arg4[%c0_4, %c0_5] : memref<128x128xf32, #tpu.memory_space<vmem>>, vector<128x128xf32>
    %cst = arith.constant dense<0.000000e+00> : vector<8x128xf32>
    %6 = tpu.matmul %4, %5, %cst {dimension_numbers = #tpu.dot_dimension_numbers<[1], [0], [0], [1], [0, 0, 1, 1], [], []>} : vector<8x128xf32>, vector<128x128xf32>, vector<8x128xf32> -> vector<8x128xf32>
    %7 = arith.addf %3, %6 : vector<8x128xf32>
    %c0_6 = arith.constant 0 : index
    %c0_7 = arith.constant 0 : index
    %8 = vector.load %arg6[%c0_6, %c0_7] : memref<8x128xf32, #tpu.memory_space<vmem>>, vector<8x128xf32>
    tpu.vector_store %arg6[%c0_6, %c0_7], %7 {strides = array<i32>} : memref<8x128xf32, #tpu.memory_space<vmem>>, vector<8x128xf32>,
    return
  }
  func.func @transform_0(%arg0: i32, %arg1: i32, %arg2: i32) -> (i32, i32) {
    %c0_i32 = arith.constant 0 : i32
    return %arg0, %arg2 : i32, i32
  }
  func.func @transform_1(%arg0: i32, %arg1: i32, %arg2: i32) -> (i32, i32) {
    %c0_i32 = arith.constant 0 : i32
    return %arg2, %arg1 : i32, i32
  }
  func.func @transform_2(%arg0: i32, %arg1: i32, %arg2: i32) -> (i32, i32) {
    %c0_i32 = arith.constant 0 : i32
    %c0_i32_0 = arith.constant 0 : i32
    %c0_i32_1 = arith.constant 0 : i32
    return %c0_i32, %c0_i32_0 : i32, i32
  }
  func.func @transform_3(%arg0: i32, %arg1: i32, %arg2: i32) -> (i32, i32) {
    %c0_i32 = arith.constant 0 : i32
    return %arg0, %arg1 : i32, i32
  }
}

</mosaic_0001>

<bundles_post_ra>
// kernel: my_linear.1
= control target key start
LH: loop header
LB: loop body
LE: loop exit
PB: predicated region body
PF: predicated region fallthrough
CT: control target
= control target key end

     0   :  { %v214_v1 = vmov 0.0   ;;  %vm215_vm0 = vmmov 0   ;;  %s294_s0 = inlined_call_operand.vmem [shape: f32[8,128], index: 0, kind: input, shape index: {}]   ;;  %s295_s1 = inlined_call_operand.vmem [shape: f32[128,128], index: 1, kind: input, shape index: {}]   ;;  %s296_s2 = inlined_call_operand.vmem [shape: f32[1,128], index: 2, kind: input, shape index: {}]   ;;  %s297_s3 = inlined_call_operand.hbm [shape: f32[8,128], index: 3, kind: output, shape index: {}]  }
   0x1   :  { %v48_v0 = vld [vmem:[%s295_s1 + $0x78] sm:$0xff]  ;;  %154 = vmatprep.subr.mxu0 %v214_v1  ;;  %v47_v2 = vld [vmem:[%s295_s1 + $0x70] sm:$0xff]  ;;  %186 = vmatprep.mubr.msk.f32.mxu0 %vm215_vm0, %v214_v1  ;;  %v46_v3 = vld [vmem:[%s295_s1 + $0x68] sm:$0xff] }
   0x2   :  { %155 = vmatpush3.msra.mxu0 %v48_v0  ;;  %v45_v4 = vld [vmem:[%s295_s1 + $0x60] sm:$0xff] }
   0x3   :  { %156 = vmatprep.subr.mxu0 %v214_v1 }
   0x4   :  { %157 = vmatpush3.msra.mxu0 %v47_v2 }
   0x5   :  { %158 = vmatprep.subr.mxu0 %v214_v1 }
   0x6   :  { %159 = vmatpush3.msra.mxu0 %v46_v3 }
   0x7   :  { %8 = vsyncpa [#allocation3], 0  ;;  %160 = vmatprep.subr.mxu0 %v214_v1  ;;  %v44_v5 = vld [vmem:[%s295_s1 + $0x58] sm:$0xff]  ;;  %v43_v6 = vld [vmem:[%s295_s1 + $0x50] sm:$0xff]  ;;  %s216_s21 = smov [#allocation2]  }
   0x8   :  { %161 = vmatpush3.msra.mxu0 %v45_v4  ;;  %v42_v7 = vld [vmem:[%s295_s1 + $0x48] sm:$0xff]  ;;  %v41_v8 = vld [vmem:[%s295_s1 + $0x40] sm:$0xff]  ;;  %v40_v9 = vld [vmem:[%s295_s1 + $0x38] sm:$0xff]  ;;  %s127_s22 = sshll.u32 %s216_s21, 4  ;;  %s128_s22 = int_to_ptr.vmem [resolvable:$true] %s127_s22 }
   0x9   :  { %162 = vmatprep.subr.mxu0 %v214_v1  ;;  %v39_v10 = vld [vmem:[%s295_s1 + $0x30] sm:$0xff]  ;;  %v38_v11 = vld [vmem:[%s295_s1 + $0x28] sm:$0xff]  ;;  %v37_v12 = vld [vmem:[%s295_s1 + $0x20] sm:$0xff]  ;;  %p197_p1 = scmp.lt.s32.totalorder %s128_s22, %s128_s22 }
   0xa   :  { %163 = vmatpush3.msra.mxu0 %v44_v5  ;;  %v36_v13 = vld [vmem:[%s295_s1 + $0x18] sm:$0xff]  ;;  %v35_v14 = vld [vmem:[%s295_s1 + $0x10] sm:$0xff]  ;;  %v34_v15 = vld [vmem:[%s295_s1 + $0x8] sm:$0xff] }
   0xb   :  { %164 = vmatprep.subr.mxu0 %v214_v1  ;;  %v33_v16 = vld [vmem:[%s295_s1] sm:$0xff]  ;;  %s192_s1 = scalar_lea.vmem %s128_s22, 128 }
   0xc   :  { %165 = vmatpush3.msra.mxu0 %v43_v6  ;;  %v32_v17 = vld [vmem:[%s294_s0] sm:$0xff]  ;;  %p193_p0 = scmp.ne.s32.totalorder %s128_s22, %s192_s1  ;;  %p198_p2 = scmp.lt.s32.totalorder %s192_s1, %s192_s1 }
   0xd   :  { %166 = vmatprep.subr.mxu0 %v214_v1  ;;  %v136_v18 = vld [vmem:[%s296_s2] ss:$0 sm:$0xff] }
   0xe   :  { %167 = vmatpush3.msra.mxu0 %v42_v7  ;;  %p199_p3 = por %p198_p2, %p197_p1 }
   0xf   :  { %168 = vmatprep.subr.mxu0 %v214_v1 }
  0x10   :  { %169 = vmatpush3.msra.mxu0 %v41_v8  ;;  %p200_p4 = pnand %p199_p3, %p193_p0 }
  0x11   :  { %170 = vmatprep.subr.mxu0 %v214_v1 }
  0x12   :  { %171 = vmatpush3.msra.mxu0 %v40_v9 }
  0x13   :  { %172 = vmatprep.subr.mxu0 %v214_v1 }
  0x14   :  { %173 = vmatpush3.msra.mxu0 %v39_v10 }
  0x15   :  { %174 = vmatprep.subr.mxu0 %v214_v1 }
  0x16   :  { %175 = vmatpush3.msra.mxu0 %v38_v11 }
  0x17   :  { %176 = vmatprep.subr.mxu0 %v214_v1 }
  0x18   :  { %177 = vmatpush3.msra.mxu0 %v37_v12 }
  0x19   :  { %178 = vmatprep.subr.mxu0 %v214_v1 }
  0x1a   :  { %179 = vmatpush3.msra.mxu0 %v36_v13 }
  0x1b   :  { %180 = vmatprep.subr.mxu0 %v214_v1 }
  0x1c   :  { %181 = vmatpush3.msra.mxu0 %v35_v14 }
  0x1d   :  { %182 = vmatprep.subr.mxu0 %v214_v1 }
  0x1e   :  { %183 = vmatpush3.msra.mxu0 %v34_v15 }
  0x1f   :  { %184 = vmatprep.subr.mxu0 %v214_v1 }
  0x20   :  { %185 = vmatpush3.msra.mxu0 %v33_v16 }
  0x21   :  { %187 = vmatmul.mubr.f32.vlgmr.msra.gmra.mxu0 %v32_v17 }
  0xe1   :  { %v115_v19 = vpop.f32.mrf.mxu0 }
  0xe2   :  { %v119_v20 = vadd.f32 %v136_v18, %v115_v19 }
  0xe3   :  { %v188_v21 = vpop.f32.mrf.mxu0 }
  0xe4   :  { %120 = vst [vmem:[#allocation2] sm:$0xff] %v119_v20 }
  0xe5   :  { %203 = shalt.err (!%p200_p4)
}
  0xe6   :  { %130 = dma.vmem_to_hbm [thread:$0]  %s128_s22, 128, %s297_s3, [#allocation3]  }
  0xe7   :  { %212 = dma.done.wait [#allocation3], 128  }
  0xe8   :  { %213 = vsyncadd [#allocation3], 4294967168 }
  0xe9   :  { %134 = vsyncpa [#allocation3], 1 }

</bundles_post_ra>
